<compile_context>
chip_gen: v6e
topology: v6e:2x2x1
jax: 0.10.0
libtpu: 0.0.40
codegen_flags: <defaults>
</compile_context>

<pallas_src>
import functools

import jax
import jax.numpy as jnp
from jax.experimental import pallas as pl
from jax.experimental.pallas import tpu as pltpu


def _round_up(a: int, b: int) -> int:
    return (a + b - 1) // b * b


def _vmem_capacity_bytes() -> int:
    """Generation-aware VMEM size (64 MiB on v7x, 128 MiB on v5e/v6e)."""
    try:
        return int(pltpu.get_tpu_info().vmem_capacity_bytes)
    except Exception:
        return 64 * 1024 * 1024          # conservative fallback (v7x-sized)


def patch_embed_kernel(p_ref, w_ref, b_ref, o_ref):
    # p_ref: (tm, K)       patch vectors, K ordered (c, kh, kw) like Conv2d weight
    # w_ref: (K, E_pad)    flattened conv weight, transposed, zero-padded on E
    # b_ref: (1, E_pad)    conv bias (f32), zero-padded on E
    # o_ref: (tm, E_pad)
    acc = jnp.dot(p_ref[...], w_ref[...], preferred_element_type=jnp.float32)
    o_ref[...] = (acc + b_ref[...]).astype(o_ref.dtype)


def _pick_row_tile(M, K, E_pad, in_itemsize, out_itemsize, budget, lhs_bufs):
    """Largest row tile (multiple of 256) whose pipelined VMEM footprint fits."""
    fixed = K * E_pad * in_itemsize + E_pad * 4          # single-buffered weight + bias
    per_row = lhs_bufs * K * in_itemsize + 2 * E_pad * out_itemsize
    tm = (budget - fixed) // per_row
    tm = max(256, (tm // 256) * 256)                     # MXU-aligned, floor at 256
    tm = min(tm, 1024)                                   # mem-bound plateau at 512-1024
    # Keep >= ~8 grid steps so v7x's two TensorCores both get work and the
    # pipeline has real lookahead at small/moderate batch.
    tm = min(tm, max(256, _round_up(pl.cdiv(M, 8), 256)))
    # Tiny problems: a single block covering all rows (sublane dim needs %8).
    tm = min(tm, _round_up(M, 8))
    return int(tm)


@functools.partial(jax.jit,
                   static_argnames=("patch_size", "compute_dtype", "out_dtype"))
def patch_embedding(x, weight, bias, patch_size,
                    compute_dtype=jnp.bfloat16, out_dtype=None):
    """x: (B, C, H, W) NCHW.  weight: (E, C, P, P) Conv2d weight.  bias: (E,)."""
    B, C, H, W = x.shape
    E = weight.shape[0]
    P = patch_size
    Gh, Gw = H // P, W // P
    N = Gh * Gw
    K = C * P * P
    M = B * N
    out_dtype = jnp.dtype(out_dtype if out_dtype is not None else x.dtype)
    compute_dtype = jnp.dtype(compute_dtype)

    # --- glue: cast FIRST, then extract patches in Conv2d's (c, kh, kw) order.
    # Doing the patchify transpose in bf16 halves its HBM read+write and removes
    # the separate cast pass over the dominant (M, K) stream.
    x = x.astype(compute_dtype)
    patches = x.reshape(B, C, Gh, P, Gw, P)
    patches = patches.transpose(0, 2, 4, 1, 3, 5)        # (B, Gh, Gw, C, P, P)
    patches = patches.reshape(M, K)
    # TODO(synk): on v5e it may pay to fuse this extraction into the kernel
    # ((1, C, P, W) input stripes + in-VMEM (gw,kw) relayout absorbed by the
    # idle XLUs); measured loss on v6e/v7x, so it stays an XLA transpose here.

    w2d = weight.astype(compute_dtype).reshape(E, K).T   # (K, E)
    b2d = bias.reshape(1, E).astype(jnp.float32)

    # --- alignment: pad only E (lane dim of the small weight / bias / output).
    # K and M stay unpadded: blocks take the full K extent (valid under the
    # "(8,128)-or-full-dim" rule) and a cdiv grid handles the ragged last row
    # tile, so no pad / slice pass ever touches the (M, K) patch stream.
    E_pad = _round_up(E, 128)
    # TODO(synk): on v6e/v7x (2x256x256 MXU) rounding E/K to 256 avoids a
    # half-utilized MXU tail; standard ViT dims are already 256-aligned.
    if E_pad != E:
        w2d = jnp.pad(w2d, ((0, 0), (0, E_pad - E)))
        b2d = jnp.pad(b2d, ((0, 0), (0, E_pad - E)))

    vmem_cap = _vmem_capacity_bytes()
    vmem_budget = vmem_cap // 2                          # headroom for compiler scratch
    # Deeper LHS buffering only where the 128 MiB parts (v5e/v6e) can pay for it.
    lhs_bufs = 3 if vmem_cap >= 100 * 1024 * 1024 else 2

    tm = _pick_row_tile(M, K, E_pad,
                        compute_dtype.itemsize, out_dtype.itemsize,
                        vmem_budget, lhs_bufs)
    grid_len = int(pl.cdiv(M, tm))
    if grid_len < 3:
        lhs_bufs = 2                                     # nothing to look ahead to

    out = pl.pallas_call(
        patch_embed_kernel,
        out_shape=jax.ShapeDtypeStruct((M, E_pad), out_dtype),
        grid_spec=pltpu.PrefetchScalarGridSpec(
            num_scalar_prefetch=0,
            grid=(grid_len,),
            in_specs=[
                pl.BlockSpec((tm, K), lambda i: (i, 0),
                             pipeline_mode=pl.Buffered(lhs_bufs)),
                # Constant block index across the grid: single-buffer to save VMEM.
                pl.BlockSpec((K, E_pad), lambda i: (0, 0),
                             pipeline_mode=pl.Buffered(1)),
                pl.BlockSpec((1, E_pad), lambda i: (0, 0),
                             pipeline_mode=pl.Buffered(1)),
            ],
            out_specs=pl.BlockSpec((tm, E_pad), lambda i: (i, 0)),
        ),
        compiler_params=pltpu.CompilerParams(
            dimension_semantics=("parallel",),           # megacore / v7x dual-TC sharding
            vmem_limit_bytes=(3 * vmem_cap) // 4,
        ),
    )(patches, w2d, b2d)

    if E_pad != E:
        out = out[:, :E]                                 # no-op at real ViT sizes
    out = out.reshape(B, N, E)
    # TODO(synk): nn.Dropout is identity at inference; training-mode dropout
    # (random mask + 1/(1-p) scale) is omitted here.
    return out


if __name__ == "__main__":
    # Small shapes consistent with the module: img=16, patch=4, in_chans=4, embed=32.
    B, C, IMG, P, E = 2, 4, 16, 4, 32
    key = jax.random.PRNGKey(0)
    kx, kw, kb = jax.random.split(key, 3)

    x = jax.random.normal(kx, (B, C, IMG, IMG), dtype=jnp.float32)
    weight = (jax.random.normal(kw, (E, C, P, P), dtype=jnp.float32)
              * (1.0 / (C * P * P) ** 0.5))
    bias = jax.random.normal(kb, (E,), dtype=jnp.float32) * 0.01

    out = jax.block_until_ready(patch_embedding(x, weight, bias, patch_size=P))

    # Reference: strided conv on the same bf16-rounded operands (the kernel
    # computes bf16 x bf16 with f32 accumulation, so compare apples-to-apples).
    xb = x.astype(jnp.bfloat16).astype(jnp.float32)
    wb = weight.astype(jnp.bfloat16).astype(jnp.float32)
    ref = jax.lax.conv_general_dilated(
        xb, wb, window_strides=(P, P), padding="VALID",
        dimension_numbers=("NCHW", "OIHW", "NCHW"))
    ref = ref + bias.reshape(1, E, 1, 1)
    ref = ref.reshape(B, E, -1).transpose(0, 2, 1)       # flatten(2).transpose(1,2)

    assert out.shape == (B, (IMG // P) ** 2, E)
    assert jnp.allclose(out, ref, atol=1e-2, rtol=1e-2), "mismatch vs conv reference"

    print("KERNEL_OK")
</pallas_src>

<mosaic_0001>
module attributes {stable_mosaic.version = 11 : i64} {
  func.func @patch_embed_kernel(%arg0: i32, %arg1: memref<32x64xbf16, #tpu.memory_space<vmem>>, %arg2: memref<64x128xbf16, #tpu.memory_space<vmem>>, %arg3: memref<1x128xf32, #tpu.memory_space<vmem>>, %arg4: memref<32x128xf32, #tpu.memory_space<vmem>>) attributes {dimension_semantics = [#tpu.dimension_semantics<parallel>], iteration_bounds = array<i64: 1>, scalar_prefetch = 0 : i64, scratch_operands = 0 : i64, tpu.core_type = #tpu.core_type<tc>, window_params = [{pipeline_mode = #tpu.pipeline_mode<double_buffered>, transform_indices = @transform_0, window_bounds = array<i64: 32, 64>}, {pipeline_mode = #tpu.pipeline_mode<synchronous>, transform_indices = @transform_1, window_bounds = array<i64: 64, 128>}, {pipeline_mode = #tpu.pipeline_mode<synchronous>, transform_indices = @transform_2, window_bounds = array<i64: 1, 128>}, {transform_indices = @transform_3, window_bounds = array<i64: 32, 128>}]} {
    %c0 = arith.constant 0 : index
    %c0_0 = arith.constant 0 : index
    %0 = vector.load %arg1[%c0, %c0_0] : memref<32x64xbf16, #tpu.memory_space<vmem>>, vector<32x64xbf16>
    %c0_1 = arith.constant 0 : index
    %c0_2 = arith.constant 0 : index
    %1 = vector.load %arg2[%c0_1, %c0_2] : memref<64x128xbf16, #tpu.memory_space<vmem>>, vector<64x128xbf16>
    %cst = arith.constant dense<0.000000e+00> : vector<32x128xf32>
    %2 = tpu.matmul %0, %1, %cst {dimension_numbers = #tpu.dot_dimension_numbers<[1], [0], [0], [1], [0, 0, 1, 1], [], []>} : vector<32x64xbf16>, vector<64x128xbf16>, vector<32x128xf32> -> vector<32x128xf32>
    %c0_3 = arith.constant 0 : index
    %c0_4 = arith.constant 0 : index
    %3 = vector.load %arg3[%c0_3, %c0_4] : memref<1x128xf32, #tpu.memory_space<vmem>>, vector<1x128xf32>
    %4 = vector.broadcast %3 : vector<1x128xf32> to vector<32x128xf32>
    %5 = arith.addf %2, %4 : vector<32x128xf32>
    %c0_5 = arith.constant 0 : index
    %c0_6 = arith.constant 0 : index
    %6 = vector.load %arg4[%c0_5, %c0_6] : memref<32x128xf32, #tpu.memory_space<vmem>>, vector<32x128xf32>
    tpu.vector_store %arg4[%c0_5, %c0_6], %5 {strides = array<i32>} : memref<32x128xf32, #tpu.memory_space<vmem>>, vector<32x128xf32>,
    return
  }
  func.func @transform_0(%arg0: i32) -> (i32, i32) {
    %c0_i32 = arith.constant 0 : i32
    %c0_i32_0 = arith.constant 0 : i32
    return %arg0, %c0_i32 : i32, i32
  }
  func.func @transform_1(%arg0: i32) -> (i32, i32) {
    %c0_i32 = arith.constant 0 : i32
    %c0_i32_0 = arith.constant 0 : i32
    %c0_i32_1 = arith.constant 0 : i32
    return %c0_i32, %c0_i32_0 : i32, i32
  }
  func.func @transform_2(%arg0: i32) -> (i32, i32) {
    %c0_i32 = arith.constant 0 : i32
    %c0_i32_0 = arith.constant 0 : i32
    %c0_i32_1 = arith.constant 0 : i32
    return %c0_i32, %c0_i32_0 : i32, i32
  }
  func.func @transform_3(%arg0: i32) -> (i32, i32) {
    %c0_i32 = arith.constant 0 : i32
    %c0_i32_0 = arith.constant 0 : i32
    return %arg0, %c0_i32 : i32, i32
  }
}

</mosaic_0001>

<bundles_post_ra>
// kernel: patch_embedding.1
= control target key start
LH: loop header
LB: loop body
LE: loop exit
PB: predicated region body
PF: predicated region fallthrough
CT: control target
= control target key end

     0   :  { %vm69_vm0 = vcmask 523264   ;;  %s250_s0 = inlined_call_operand.vmem [shape: bf16[32,64], index: 0, kind: input, shape index: {}]   ;;  %s251_s1 = inlined_call_operand.vmem [shape: bf16[64,128], index: 1, kind: input, shape index: {}]   ;;  %s252_s2 = inlined_call_operand.vmem [shape: f32[1,128], index: 2, kind: input, shape index: {}]   ;;  %s253_s3 = inlined_call_operand.hbm [shape: f32[32,128], index: 3, kind: output, shape index: {}]  }
   0x1   :  { %v175_v0 = vld [vmem:[%s251_s1 + $0x18] sm:$0xff]   ;;  %v176_v1 = vld [vmem:[%s251_s1 + $0x10] sm:$0xff]   ;;  %v177_v2 = vld [vmem:[%s251_s1 + $0x8] sm:$0xff]  }
   0x2   :  { %160 = vmatprep.subr.bf16.mxu0 %v175_v0  ;;  %v179_v3 = vld [vmem:[%s250_s0] sm:$0xff]  }
   0x3   :  { %161 = vmatpush3.bf16.msra.mxu0 %v175_v0  ;;  %168 = vmatprep.mubr.msk.bf16.mxu0 %vm69_vm0, %v179_v3 }
   0x4   :  { %162 = vmatprep.subr.bf16.mxu0 %v176_v1 }
   0x5   :  { %8 = vsyncpa [#allocation3], 0  ;;  %v178_v4 = vld [vmem:[%s251_s1] sm:$0xff]   ;;  %v180_v5 = vld [vmem:[%s250_s0 + $0x8] sm:$0xff]   ;;  %s203_s26 = smov [#allocation2]  }
   0x6   :  { %v145_v6 = vld [vmem:[%s252_s2] ss:$0 sm:$0xff]  ;;  %s134_s27 = sshll.u32 %s203_s26, 4  ;;  %s135_s27 = int_to_ptr.vmem [resolvable:$true] %s134_s27 }
   0x7   :  { %163 = vmatpush3.bf16.msra.mxu0 %v176_v1  ;;  %s181_s0 = scalar_lea.vmem %s135_s27, 512  ;;  %p186_p1 = scmp.lt.s32.totalorder %s135_s27, %s135_s27 }
   0x8   :  { %164 = vmatprep.subr.bf16.mxu0 %v177_v2  ;;  %p182_p0 = scmp.ne.s32.totalorder %s135_s27, %s181_s0  ;;  %p187_p2 = scmp.lt.s32.totalorder %s181_s0, %s181_s0 }
   0xa   :  { %p188_p3 = por %p187_p2, %p186_p1 }
   0xb   :  { %165 = vmatpush3.bf16.msra.mxu0 %v177_v2 }
   0xc   :  { %166 = vmatprep.subr.bf16.mxu0 %v178_v4  ;;  %p189_p4 = pnand %p188_p3, %p182_p0 }
   0xf   :  { %167 = vmatpush3.bf16.msra.mxu0 %v178_v4 }
  0x12   :  { %169 = vmatmul.mubr.msk.bf16.vlgmr.msra.gmra.mxu0 %vm69_vm0, %v180_v5 }
  0xd2   :  { %v170_v7 = vpop.f32.mrf.mxu0 }
  0xd3   :  { %v119_v8 = vadd.f32 %v170_v7, %v145_v6 }
  0xd4   :  { %v110_v9 = vpop.f32.mrf.mxu0 }
  0xd5   :  { %127 = vst [vmem:[#allocation2 + $0x10] sm:$0xff] %v119_v8  ;;  %v111_v10 = vadd.f32 %v145_v6, %v110_v9 }
  0xd6   :  { %v171_v11 = vpop.f32.mrf.mxu0 }
  0xd7   :  { %125 = vst [vmem:[#allocation2] sm:$0xff] %v111_v10  ;;  %v122_v12 = vadd.f32 %v171_v11, %v145_v6 }
  0xd8   :  { %v113_v13 = vpop.f32.mrf.mxu0 }
  0xd9   :  { %128 = vst [vmem:[#allocation2 + $0x18] sm:$0xff] %v122_v12  ;;  %v114_v14 = vadd.f32 %v145_v6, %v113_v13 }
  0xdb   :  { %126 = vst [vmem:[#allocation2 + $0x8] sm:$0xff] %v114_v14 }
  0xdc   :  { %192 = shalt.err (!%p189_p4)
}
  0xdd   :  { %s204_s1 = smov 128   ;;  %s205_s2 = smov 8  }
  0xde   :  { %140 = dma.vmem_to_hbm [thread:$0]  %s135_s27, 512, %s253_s3, [#allocation3], %s204_s1, %s204_s1, %s205_s2  }
  0xdf   :  { %201 = dma.done.wait [#allocation3], 512  }
  0xe0   :  { %202 = vsyncadd [#allocation3], 4294966784 }
  0xe1   :  { %144 = vsyncpa [#allocation3], 1 }

</bundles_post_ra>
